<compile_context>
chip_gen: v7x
topology: tpu7x:2x2x1
jax: 0.10.0
libtpu: 0.0.40
codegen_flags: <defaults>
</compile_context>

<pallas_src>
import functools

import jax
import jax.numpy as jnp
from jax.experimental import pallas as pl
from jax.experimental.pallas import tpu as pltpu


class NestedTensor:
    """Minimal stand-in for the PyTorch NestedTensor (mask is unused by this module)."""

    def __init__(self, tensors, mask=None):
        self.tensors = tensors
        self.mask = mask

    def decompose(self):
        return self.tensors, self.mask


def pos_embed_kernel(col_ref, row_ref, hgt_ref, out_ref, *, d, h, w, feats):
    """Builds the channels-last positional-embedding slab.

    col_ref/row_ref/hgt_ref: (50, P) embedding tables in VMEM.
    out_ref: (h*w*d, 3P) slab; flattened row order r = y*(w*d) + x*d + z.
    """
    P = feats
    M = h * w * d

    col = col_ref[0:w, :]  # (w, P) -- varies along the w ("x") axis
    row = row_ref[0:h, :]  # (h, P) -- varies along the h ("y") axis
    hgt = hgt_ref[0:d, :]  # (d, P) -- varies along the d ("z") axis

    # col block: each col row repeated d consecutive times, then tiled h times.
    col_rep = jnp.broadcast_to(col[:, None, :], (w, d, P)).reshape(w * d, P)
    col_blk = jnp.broadcast_to(col_rep[None, :, :], (h, w * d, P)).reshape(M, P)
    # row block: each row repeated w*d consecutive times.
    row_blk = jnp.broadcast_to(row[:, None, :], (h, w * d, P)).reshape(M, P)
    # hgt block: the d rows tiled h*w times.
    hgt_blk = jnp.broadcast_to(hgt[None, :, :], (h * w, d, P)).reshape(M, P)

    # 128-aligned lane slices -> unmasked, full-lane vector stores.
    out_ref[:, 0:P] = col_blk
    out_ref[:, P:2 * P] = row_blk
    out_ref[:, 2 * P:3 * P] = hgt_blk


def position_embedding_learned(tensor_list, params):
    """tensor_list: NestedTensor (or array) whose tensors have shape (B, C, d, h, w).

    Returns pos of shape (B, 3*P, h, w, d), dtype float32.
    """
    x = tensor_list.tensors if isinstance(tensor_list, NestedTensor) else tensor_list
    B = x.shape[0]
    d, h, w = x.shape[-3:]
    P = params["col"].shape[-1]
    M = h * w * d

    flat = pl.pallas_call(
        functools.partial(pos_embed_kernel, d=d, h=h, w=w, feats=P),
        out_shape=jax.ShapeDtypeStruct((M, 3 * P), jnp.float32),
        grid_spec=pltpu.PrefetchScalarGridSpec(
            num_scalar_prefetch=0,
            grid=(1,),
            in_specs=[
                pl.BlockSpec(params["col"].shape, lambda i: (0, 0)),
                pl.BlockSpec(params["row"].shape, lambda i: (0, 0)),
                pl.BlockSpec(params["hgt"].shape, lambda i: (0, 0)),
            ],
            out_specs=pl.BlockSpec((M, 3 * P), lambda i: (0, 0)),
        ),
        compiler_params=pltpu.CompilerParams(
            dimension_semantics=("arbitrary",)),
    )(params["col"], params["row"], params["hgt"])

    # Layout plumbing outside the kernel (keeps kernel stores lane-dense):
    pos = flat.reshape(h, w, d, 3 * P)
    pos = jnp.transpose(pos, (3, 0, 1, 2))                       # (3P, h, w, d)
    pos = jnp.broadcast_to(pos[None], (B, 3 * P, h, w, d))       # batch "repeat"
    return pos


def init_params(key, num_pos_feats=128, num_embeddings=50):
    # nn.init.uniform_ default: U[0, 1)
    k_h, k_r, k_c = jax.random.split(key, 3)
    return {
        "hgt": jax.random.uniform(k_h, (num_embeddings, num_pos_feats), jnp.float32),
        "row": jax.random.uniform(k_r, (num_embeddings, num_pos_feats), jnp.float32),
        "col": jax.random.uniform(k_c, (num_embeddings, num_pos_feats), jnp.float32),
    }


if __name__ == "__main__":
    # Small, tile-friendly shapes: batch=2, channels=4, spatial volume 8x8x8, P=128
    # (module default P is 256; 128 keeps the demo small while staying lane-aligned).
    num_pos_feats = 128
    B, C, D, H, W = 2, 4, 8, 8, 8

    key = jax.random.PRNGKey(0)
    k_x, k_p = jax.random.split(key)
    x = jax.random.normal(k_x, (B, C, D, H, W), jnp.float32)  # values unused (shape only)
    params = init_params(k_p, num_pos_feats)

    tensor_list = NestedTensor(x, mask=None)
    pos = position_embedding_learned(tensor_list, params)
    jax.block_until_ready(pos)

    # Pure-JAX reference of the intended semantics.
    P = num_pos_feats
    d, h, w = D, H, W
    gx = jnp.broadcast_to(params["col"][:w][None, :, None, :], (h, w, d, P))
    gy = jnp.broadcast_to(params["row"][:h][:, None, None, :], (h, w, d, P))
    gz = jnp.broadcast_to(params["hgt"][:d][None, None, :, :], (h, w, d, P))
    ref = jnp.concatenate([gx, gy, gz], axis=-1)                  # (h, w, d, 3P)
    ref = jnp.broadcast_to(jnp.transpose(ref, (3, 0, 1, 2))[None], (B, 3 * P, h, w, d))

    assert pos.shape == (B, 3 * P, H, W, D), pos.shape
    assert bool(jnp.allclose(pos, ref)), "kernel output mismatch vs reference"
    print("KERNEL_OK")
</pallas_src>

<mosaic_0001>
module attributes {stable_mosaic.version = 11 : i64} {
  func.func @pos_embed_kernel(%arg0: i32, %arg1: memref<50x128xf32, #tpu.memory_space<vmem>>, %arg2: memref<50x128xf32, #tpu.memory_space<vmem>>, %arg3: memref<50x128xf32, #tpu.memory_space<vmem>>, %arg4: memref<512x384xf32, #tpu.memory_space<vmem>>) attributes {dimension_semantics = [#tpu.dimension_semantics<arbitrary>], iteration_bounds = array<i64: 1>, scalar_prefetch = 0 : i64, scratch_operands = 0 : i64, tpu.core_type = #tpu.core_type<tc>, window_params = [{pipeline_mode = #tpu.pipeline_mode<synchronous>, transform_indices = @transform_0, window_bounds = array<i64: 50, 128>}, {pipeline_mode = #tpu.pipeline_mode<synchronous>, transform_indices = @transform_1, window_bounds = array<i64: 50, 128>}, {pipeline_mode = #tpu.pipeline_mode<synchronous>, transform_indices = @transform_2, window_bounds = array<i64: 50, 128>}, {pipeline_mode = #tpu.pipeline_mode<synchronous>, transform_indices = @transform_3, window_bounds = array<i64: 512, 384>}]} {
    %c0 = arith.constant 0 : index
    %c0_0 = arith.constant 0 : index
    %0 = vector.load %arg1[%c0, %c0_0] : memref<50x128xf32, #tpu.memory_space<vmem>>, vector<8x128xf32>
    %c0_1 = arith.constant 0 : index
    %c0_2 = arith.constant 0 : index
    %1 = vector.load %arg2[%c0_1, %c0_2] : memref<50x128xf32, #tpu.memory_space<vmem>>, vector<8x128xf32>
    %c0_3 = arith.constant 0 : index
    %c0_4 = arith.constant 0 : index
    %2 = vector.load %arg3[%c0_3, %c0_4] : memref<50x128xf32, #tpu.memory_space<vmem>>, vector<8x128xf32>
    %3 = vector.shape_cast %0 : vector<8x128xf32> to vector<8x1x128xf32>
    %4 = vector.shape_cast %3 : vector<8x1x128xf32> to vector<8x1x128xf32>
    %5 = vector.broadcast %4 : vector<8x1x128xf32> to vector<8x8x128xf32>
    %6 = vector.shape_cast %5 : vector<8x8x128xf32> to vector<64x128xf32>
    %7 = vector.shape_cast %6 : vector<64x128xf32> to vector<1x64x128xf32>
    %8 = vector.shape_cast %7 : vector<1x64x128xf32> to vector<1x64x128xf32>
    %9 = vector.broadcast %8 : vector<1x64x128xf32> to vector<8x64x128xf32>
    %10 = vector.shape_cast %9 : vector<8x64x128xf32> to vector<512x128xf32>
    %11 = vector.shape_cast %1 : vector<8x128xf32> to vector<8x1x128xf32>
    %12 = vector.shape_cast %11 : vector<8x1x128xf32> to vector<8x1x128xf32>
    %13 = vector.broadcast %12 : vector<8x1x128xf32> to vector<8x64x128xf32>
    %14 = vector.shape_cast %13 : vector<8x64x128xf32> to vector<512x128xf32>
    %15 = vector.shape_cast %2 : vector<8x128xf32> to vector<1x8x128xf32>
    %16 = vector.shape_cast %15 : vector<1x8x128xf32> to vector<1x8x128xf32>
    %17 = vector.broadcast %16 : vector<1x8x128xf32> to vector<64x8x128xf32>
    %18 = vector.shape_cast %17 : vector<64x8x128xf32> to vector<512x128xf32>
    %c0_5 = arith.constant 0 : index
    %c0_6 = arith.constant 0 : index
    %19 = vector.load %arg4[%c0_5, %c0_6] : memref<512x384xf32, #tpu.memory_space<vmem>>, vector<512x128xf32>
    tpu.vector_store %arg4[%c0_5, %c0_6], %10 {strides = array<i32>} : memref<512x384xf32, #tpu.memory_space<vmem>>, vector<512x128xf32>,
    %c0_7 = arith.constant 0 : index
    %c128 = arith.constant 128 : index
    %20 = vector.load %arg4[%c0_7, %c128] : memref<512x384xf32, #tpu.memory_space<vmem>>, vector<512x128xf32>
    tpu.vector_store %arg4[%c0_7, %c128], %14 {strides = array<i32>} : memref<512x384xf32, #tpu.memory_space<vmem>>, vector<512x128xf32>,
    %c0_8 = arith.constant 0 : index
    %c256 = arith.constant 256 : index
    %21 = vector.load %arg4[%c0_8, %c256] : memref<512x384xf32, #tpu.memory_space<vmem>>, vector<512x128xf32>
    tpu.vector_store %arg4[%c0_8, %c256], %18 {strides = array<i32>} : memref<512x384xf32, #tpu.memory_space<vmem>>, vector<512x128xf32>,
    return
  }
  func.func @transform_0(%arg0: i32) -> (i32, i32) {
    %c0_i32 = arith.constant 0 : i32
    %c0_i32_0 = arith.constant 0 : i32
    %c0_i32_1 = arith.constant 0 : i32
    return %c0_i32, %c0_i32_0 : i32, i32
  }
  func.func @transform_1(%arg0: i32) -> (i32, i32) {
    %c0_i32 = arith.constant 0 : i32
    %c0_i32_0 = arith.constant 0 : i32
    %c0_i32_1 = arith.constant 0 : i32
    return %c0_i32, %c0_i32_0 : i32, i32
  }
  func.func @transform_2(%arg0: i32) -> (i32, i32) {
    %c0_i32 = arith.constant 0 : i32
    %c0_i32_0 = arith.constant 0 : i32
    %c0_i32_1 = arith.constant 0 : i32
    return %c0_i32, %c0_i32_0 : i32, i32
  }
  func.func @transform_3(%arg0: i32) -> (i32, i32) {
    %c0_i32 = arith.constant 0 : i32
    %c0_i32_0 = arith.constant 0 : i32
    %c0_i32_1 = arith.constant 0 : i32
    return %c0_i32, %c0_i32_0 : i32, i32
  }
}

</mosaic_0001>

<bundles_post_ra>
// kernel: tpu_custom_call.1
= control target key start
LH: loop header
LB: loop body
LE: loop exit
PB: predicated region body
PF: predicated region fallthrough
CT: control target
= control target key end

     0   :  { %8 = vsyncpa [#allocation3], 0  ;;  %s799_s0 = inlined_call_operand.hbm [shape: f32[50,128], index: 0, kind: input, shape index: {}]   ;;  %s800_s1 = inlined_call_operand.hbm [shape: f32[50,128], index: 1, kind: input, shape index: {}]   ;;  %s801_s2 = inlined_call_operand.hbm [shape: f32[50,128], index: 2, kind: input, shape index: {}]   ;;  %s802_s3 = inlined_call_operand.hbm [shape: f32[512,384], index: 3, kind: output, shape index: {}]  }
   0x1   :  { %9 = vsyncpa [#allocation6], 0 }
   0x2   :  { %10 = vsyncpa [#allocation4], 0  ;;  %s554_s12 = smov [#allocation5]   ;;  %s555_s14 = smov [#allocation2]  }
   0x3   :  { %s28_s13 = sshll.u32 %s554_s12, 4  ;;  %s16_s15 = sshll.u32 %s555_s14, 4  ;;  %s29_s13 = int_to_ptr.vmem [resolvable:$true] %s28_s13  ;;  %s583_s15 = int_to_ptr.vmem [resolvable:$true] %s16_s15 }
   0x4   :  { %s460_s18 = scalar_lea.hbm %s800_s1, 896 }
   0x5   :  { %p461_p0 = scmp.ne.s32.totalorder %s800_s1, %s460_s18  ;;  %p464_p1 = scmp.lt.u32.totalorder %s460_s18, %s800_s1 }
   0x7   :  { %p466_p2 = pnand %p464_p1, %p461_p0 }
   0x9   :  { %469 = shalt.err (!%p466_p2)
}
   0xa   :  { %s470_s23 = scalar_lea.vmem %s29_s13, 896  ;;  %p475_p4 = scmp.lt.s32.totalorder %s29_s13, %s29_s13 }
   0xb   :  { %p471_p3 = scmp.ne.s32.totalorder %s29_s13, %s470_s23  ;;  %p476_p5 = scmp.lt.s32.totalorder %s470_s23, %s470_s23 }
   0xd   :  { %p477_p6 = por %p476_p5, %p475_p4 }
   0xf   :  { %p478_p7 = pnand %p477_p6, %p471_p3 }
  0x11   :  { %481 = shalt.err (!%p478_p7)
}
  0x12   :  { %s556_s24 = smov 128   ;;  %s557_s25 = smov 8  }
  0x13   :  { %34 = dma.hbm_to_vmem [thread:$0]  %s800_s1, 896, %s29_s13, [#allocation6], %s556_s24, %s556_s24, %s557_s25  }
  0x14   :  { %s482_s30 = scalar_lea.hbm %s799_s0, 896 }
  0x15   :  { %p483_p8 = scmp.ne.s32.totalorder %s799_s0, %s482_s30  ;;  %p486_p9 = scmp.lt.u32.totalorder %s482_s30, %s799_s0 }
  0x17   :  { %p488_p10 = pnand %p486_p9, %p483_p8 }
  0x19   :  { %491 = shalt.err (!%p488_p10)
}
  0x1a   :  { %s492_s8 = scalar_lea.vmem %s583_s15, 896  ;;  %p497_p12 = scmp.lt.s32.totalorder %s583_s15, %s583_s15 }
  0x1b   :  { %p493_p11 = scmp.ne.s32.totalorder %s583_s15, %s492_s8  ;;  %p498_p13 = scmp.lt.s32.totalorder %s492_s8, %s492_s8 }
  0x1d   :  { %p499_p0 = por %p498_p13, %p497_p12 }
  0x1f   :  { %p500_p1 = pnand %p499_p0, %p493_p11 }
  0x21   :  { %503 = shalt.err (!%p500_p1)
}
  0x22   :  { %22 = dma.hbm_to_vmem [thread:$0]  %s799_s0, 896, %s583_s15, [#allocation3], %s556_s24, %s556_s24, %s557_s25  }
  0x23   :  { %s558_s10 = smov [#allocation7]   ;;  %s504_s14 = scalar_lea.hbm %s801_s2, 896 }
  0x24   :  { %s40_s11 = sshll.u32 %s558_s10, 4  ;;  %p505_p2 = scmp.ne.s32.totalorder %s801_s2, %s504_s14  ;;  %s41_s11 = int_to_ptr.vmem [resolvable:$true] %s40_s11 }
  0x25   :  { %p508_p3 = scmp.lt.u32.totalorder %s504_s14, %s801_s2 }
  0x27   :  { %p510_p4 = pnand %p508_p3, %p505_p2 }
  0x29   :  { %513 = shalt.err (!%p510_p4)
}
  0x2a   :  { %s514_s20 = scalar_lea.vmem %s41_s11, 896  ;;  %p519_p6 = scmp.lt.s32.totalorder %s41_s11, %s41_s11 }
  0x2b   :  { %p515_p5 = scmp.ne.s32.totalorder %s41_s11, %s514_s20  ;;  %p520_p7 = scmp.lt.s32.totalorder %s514_s20, %s514_s20 }
  0x2d   :  { %p521_p8 = por %p520_p7, %p519_p6 }
  0x2f   :  { %p522_p9 = pnand %p521_p8, %p515_p5 }
  0x31   :  { %525 = shalt.err (!%p522_p9)
}
  0x32   :  { %46 = dma.hbm_to_vmem [thread:$0]  %s801_s2, 896, %s41_s11, [#allocation6], %s556_s24, %s556_s24, %s557_s25  }
  0x33   :  { %548 = dma.done.wait [#allocation3], 896  }
  0x34   :  { %549 = vsyncadd [#allocation3], 4294966400 }
  0x35   :  { %550 = dma.done.wait [#allocation6], 1792  }
  0x36   :  { %551 = vsyncadd [#allocation6], 4294965504  ;;  %v64_v0 = vlaneseq  ;;  %v559_v1 = vmov 1966171168   ;;  %v637_v6 = vld [vmem:[#allocation2] sm:$0xff]  ;;  %v641_v8 = vld [vmem:[#allocation5] sm:$0xff] }
  0x37   :  { %v62_v2 = vunpack.c.l.s4 %v559_v1  ;;  %v643_v9 = vld [vmem:[#allocation7] sm:$0xff]  ;;  %v60_v11 = vcombine.high %v637_v6, %v637_v6  ;;  %v150_v13 = vcombine.high %v641_v8, %v641_v8  ;;  %s560_s2 = smov [#allocation8]  }
  0x38   :  { %v65_v3 = vshrl.u32 %v64_v0, 7  ;;  %367 = vst [vmem:[#allocation8 + $0x10] sm:$0xff] %v643_v9  ;;  %368 = vst [vmem:[#allocation8 + $0x28] sm:$0xff] %v643_v9  ;;  %s778_s21 = sshll.u32 %s560_s2, 4  ;;  %s437_s21 = int_to_ptr.vmem [resolvable:$true] %s778_s21 }
  0x39   :  { %v63_v4 = vunpack.c.0.s8 %v62_v2  ;;  %369 = vst [vmem:[#allocation8 + $0x40] sm:$0xff] %v643_v9  ;;  %370 = vst [vmem:[#allocation8 + $0x58] sm:$0xff] %v643_v9  ;;  %s526_s22 = scalar_lea.vmem %s437_s21, 24576  ;;  %p531_p11 = scmp.lt.s32.totalorder %s437_s21, %s437_s21 }
  0x3a   :  { %v639_v7 = vsub.s32 0, %v65_v3  ;;  %371 = vst [vmem:[#allocation8 + $0x70] sm:$0xff] %v643_v9  ;;  %372 = vst [vmem:[#allocation8 + $0x88] sm:$0xff] %v643_v9  ;;  %p527_p10 = scmp.ne.s32.totalorder %s437_s21, %s526_s22  ;;  %p532_p12 = scmp.lt.s32.totalorder %s526_s22, %s526_s22 }
  0x3b   :  { %v635_v5 = vsub.s32 %v63_v4, %v65_v3  ;;  %373 = vst [vmem:[#allocation8 + $0xa0] sm:$0xff] %v643_v9  ;;  %374 = vst [vmem:[#allocation8 + $0xb8] sm:$0xff] %v643_v9 }
  0x3c   :  { %375 = vst [vmem:[#allocation8 + $0xd0] sm:$0xff] %v643_v9  ;;  %376 = vst [vmem:[#allocation8 + $0xe8] sm:$0xff] %v643_v9  ;;  %p533_p13 = por %p532_p12, %p531_p11 }
  0x3d   :  { %v647_v10 = vrot.slane %v637_v6, %v635_v5  ;;  %v653_v12 = vrot.slane %v641_v8, %v635_v5  ;;  %377 = vst [vmem:[#allocation8 + $0x100] sm:$0xff] %v643_v9  ;;  %378 = vst [vmem:[#allocation8 + $0x118] sm:$0xff] %v643_v9  ;;  %v74_v16 = vrot.slane %v60_v11, %v635_v5 }
  0x3e   :  { %379 = vst [vmem:[#allocation8 + $0x130] sm:$0xff] %v643_v9  ;;  %380 = vst [vmem:[#allocation8 + $0x148] sm:$0xff] %v643_v9  ;;  %v737_v19 = vrot.slane %v150_v13, %v635_v5  ;;  %p534_p0 = pnand %p533_p13, %p527_p10 }
  0x3f   :  { %381 = vst [vmem:[#allocation8 + $0x160] sm:$0xff] %v643_v9  ;;  %382 = vst [vmem:[#allocation8 + $0x178] sm:$0xff] %v643_v9  ;;  %v83_v14 = vrot.slane %v647_v10, %v635_v5  ;;  %v75_v15 = vcombine.high %v647_v10, %v647_v10  ;;  %v173_v17 = vrot.slane %v653_v12, %v635_v5 }
  0x40   :  { %383 = vst [vmem:[#allocation8 + $0x190] sm:$0xff] %v643_v9  ;;  %384 = vst [vmem:[#allocation8 + $0x1a8] sm:$0xff] %v643_v9  ;;  %v165_v18 = vcombine.high %v653_v12, %v653_v12  ;;  %v90_v23 = vrot.slane %v74_v16, %v635_v5  ;;  %v76_v24 = vcombine.high %v74_v16, %v74_v16 }
  0x41   :  { %385 = vst [vmem:[#allocation8 + $0x1c0] sm:$0xff] %v643_v9  ;;  %386 = vst [vmem:[#allocation8 + $0x1d8] sm:$0xff] %v643_v9  ;;  %v112_v20 = vrot.slane %v83_v14, %v639_v7  ;;  %v97_v21 = vrot.slane %v75_v15, %v635_v5  ;;  %v105_v22 = vcombine.high %v83_v14, %v83_v14 }
  0x42   :  { %387 = vst [vmem:[#allocation8 + $0x1f0] sm:$0xff] %v643_v9  ;;  %388 = vst [vmem:[#allocation8 + $0x208] sm:$0xff] %v643_v9  ;;  %v202_v25 = vrot.slane %v173_v17, %v639_v7  ;;  %v744_v26 = vrot.slane %v165_v18, %v635_v5  ;;  %v195_v27 = vcombine.high %v173_v17, %v173_v17 }
  0x43   :  { %389 = vst [vmem:[#allocation8 + $0x220] sm:$0xff] %v643_v9  ;;  %390 = vst [vmem:[#allocation8 + $0x238] sm:$0xff] %v643_v9  ;;  %v116_v28 = vrot.slane %v97_v21, %v639_v7  ;;  %v120_v29 = vrot.slane %v105_v22, %v639_v7  ;;  %v107_v30 = vcombine.high %v97_v21, %v97_v21 }
  0x44   :  { %391 = vst [vmem:[#allocation8 + $0x250] sm:$0xff] %v643_v9  ;;  %392 = vst [vmem:[#allocation8 + $0x268] sm:$0xff] %v643_v9  ;;  %v128_v31 = vrot.slane %v90_v23, %v639_v7  ;;  %v750_v32 = vrot.slane %v76_v24, %v635_v5  ;;  %v106_v33 = vcombine.high %v90_v23, %v90_v23 }
  0x45   :  { %393 = vst [vmem:[#allocation8 + $0x280] sm:$0xff] %v643_v9  ;;  %394 = vst [vmem:[#allocation8 + $0x298] sm:$0xff] %v643_v9  ;;  %v206_v34 = vrot.slane %v744_v26, %v639_v7  ;;  %v210_v35 = vrot.slane %v195_v27, %v639_v7  ;;  %v124_v36 = vrot.slane %v107_v30, %v639_v7 }
  0x46   :  { %395 = vst [vmem:[#allocation8 + $0x2b0] sm:$0xff] %v643_v9  ;;  %396 = vst [vmem:[#allocation8 + $0x2c8] sm:$0xff] %v643_v9  ;;  %v197_v37 = vcombine.high %v744_v26, %v744_v26  ;;  %v760_v38 = vrot.slane %v737_v19, %v635_v5  ;;  %v166_v39 = vcombine.high %v737_v19, %v737_v19 }
  0x47   :  { %397 = vst [vmem:[#allocation8 + $0x2e0] sm:$0xff] %v643_v9  ;;  %398 = vst [vmem:[#allocation8 + $0x2f8] sm:$0xff] %v643_v9  ;;  %v132_v40 = vrot.slane %v750_v32, %v639_v7  ;;  %v136_v41 = vrot.slane %v106_v33, %v639_v7  ;;  %v108_v42 = vcombine.high %v750_v32, %v750_v32 }
  0x48   :  { %399 = vst [vmem:[#allocation8 + $0x310] sm:$0xff] %v643_v9  ;;  %400 = vst [vmem:[#allocation8 + $0x328] sm:$0xff] %v643_v9  ;;  %v214_v43 = vrot.slane %v197_v37, %v639_v7  ;;  %v218_v44 = vrot.slane %v760_v38, %v639_v7  ;;  %v773_v45 = vrot.slane %v166_v39, %v635_v5 }
  0x49   :  { %401 = vst [vmem:[#allocation8 + $0x340] sm:$0xff] %v643_v9  ;;  %402 = vst [vmem:[#allocation8 + $0x358] sm:$0xff] %v643_v9  ;;  %v196_v46 = vcombine.high %v760_v38, %v760_v38  ;;  %v140_v47 = vrot.slane %v108_v42, %v639_v7 }
  0x4a   :  { %403 = vst [vmem:[#allocation8 + $0x370] sm:$0xff] %v643_v9  ;;  %404 = vst [vmem:[#allocation8 + $0x388] sm:$0xff] %v643_v9  ;;  %v222_v48 = vrot.slane %v773_v45, %v639_v7  ;;  %v198_v50 = vcombine.high %v773_v45, %v773_v45 }
  0x4b   :  { %405 = vst [vmem:[#allocation8 + $0x3a0] sm:$0xff] %v643_v9  ;;  %406 = vst [vmem:[#allocation8 + $0x3b8] sm:$0xff] %v643_v9  ;;  %v226_v49 = vrot.slane %v196_v46, %v639_v7 }
  0x4c   :  { %407 = vst [vmem:[#allocation8 + $0x3d0] sm:$0xff] %v643_v9  ;;  %408 = vst [vmem:[#allocation8 + $0x3e8] sm:$0xff] %v643_v9  ;;  %v230_v51 = vrot.slane %v198_v50, %v639_v7 }
  0x4d   :  { %409 = vst [vmem:[#allocation8 + $0x400] sm:$0xff] %v643_v9  ;;  %410 = vst [vmem:[#allocation8 + $0x418] sm:$0xff] %v643_v9 }
  0x4e   :  { %411 = vst [vmem:[#allocation8 + $0x430] sm:$0xff] %v643_v9  ;;  %412 = vst [vmem:[#allocation8 + $0x448] sm:$0xff] %v643_v9 }
  0x4f   :  { %413 = vst [vmem:[#allocation8 + $0x460] sm:$0xff] %v643_v9  ;;  %414 = vst [vmem:[#allocation8 + $0x478] sm:$0xff] %v643_v9 }
  0x50   :  { %415 = vst [vmem:[#allocation8 + $0x490] sm:$0xff] %v643_v9  ;;  %416 = vst [vmem:[#allocation8 + $0x4a8] sm:$0xff] %v643_v9 }
  0x51   :  { %417 = vst [vmem:[#allocation8 + $0x4c0] sm:$0xff] %v643_v9  ;;  %418 = vst [vmem:[#allocation8 + $0x4d8] sm:$0xff] %v643_v9 }
  0x52   :  { %419 = vst [vmem:[#allocation8 + $0x4f0] sm:$0xff] %v643_v9  ;;  %420 = vst [vmem:[#allocation8 + $0x508] sm:$0xff] %v643_v9 }
  0x53   :  { %421 = vst [vmem:[#allocation8 + $0x520] sm:$0xff] %v643_v9  ;;  %422 = vst [vmem:[#allocation8 + $0x538] sm:$0xff] %v643_v9 }
  0x54   :  { %423 = vst [vmem:[#allocation8 + $0x550] sm:$0xff] %v643_v9  ;;  %424 = vst [vmem:[#allocation8 + $0x568] sm:$0xff] %v643_v9 }
  0x55   :  { %425 = vst [vmem:[#allocation8 + $0x580] sm:$0xff] %v643_v9  ;;  %426 = vst [vmem:[#allocation8 + $0x598] sm:$0xff] %v643_v9 }
  0x56   :  { %427 = vst [vmem:[#allocation8 + $0x5b0] sm:$0xff] %v643_v9  ;;  %428 = vst [vmem:[#allocation8 + $0x5c8] sm:$0xff] %v643_v9 }
  0x57   :  { %429 = vst [vmem:[#allocation8 + $0x5e0] sm:$0xff] %v643_v9  ;;  %430 = vst [vmem:[#allocation8 + $0x5f8] sm:$0xff] %v643_v9 }
  0x58   :  { %239 = vst [vmem:[#allocation8] sm:$0xff] %v112_v20  ;;  %247 = vst [vmem:[#allocation8 + $0xc0] sm:$0xff] %v112_v20 }
  0x59   :  { %255 = vst [vmem:[#allocation8 + $0x180] sm:$0xff] %v112_v20  ;;  %263 = vst [vmem:[#allocation8 + $0x240] sm:$0xff] %v112_v20 }
  0x5a   :  { %271 = vst [vmem:[#allocation8 + $0x300] sm:$0xff] %v112_v20  ;;  %279 = vst [vmem:[#allocation8 + $0x3c0] sm:$0xff] %v112_v20 }
  0x5b   :  { %287 = vst [vmem:[#allocation8 + $0x480] sm:$0xff] %v112_v20  ;;  %295 = vst [vmem:[#allocation8 + $0x540] sm:$0xff] %v112_v20 }
  0x5c   :  { %303 = vst [vmem:[#allocation8 + $0x8] sm:$0xff] %v202_v25  ;;  %304 = vst [vmem:[#allocation8 + $0x20] sm:$0xff] %v202_v25 }
  0x5d   :  { %305 = vst [vmem:[#allocation8 + $0x38] sm:$0xff] %v202_v25  ;;  %306 = vst [vmem:[#allocation8 + $0x50] sm:$0xff] %v202_v25 }
  0x5e   :  { %307 = vst [vmem:[#allocation8 + $0x68] sm:$0xff] %v202_v25  ;;  %308 = vst [vmem:[#allocation8 + $0x80] sm:$0xff] %v202_v25 }
  0x5f   :  { %309 = vst [vmem:[#allocation8 + $0x98] sm:$0xff] %v202_v25  ;;  %310 = vst [vmem:[#allocation8 + $0xb0] sm:$0xff] %v202_v25 }
  0x60   :  { %240 = vst [vmem:[#allocation8 + $0x18] sm:$0xff] %v116_v28  ;;  %248 = vst [vmem:[#allocation8 + $0xd8] sm:$0xff] %v116_v28 }
  0x61   :  { %256 = vst [vmem:[#allocation8 + $0x198] sm:$0xff] %v116_v28  ;;  %264 = vst [vmem:[#allocation8 + $0x258] sm:$0xff] %v116_v28 }
  0x62   :  { %272 = vst [vmem:[#allocation8 + $0x318] sm:$0xff] %v116_v28  ;;  %280 = vst [vmem:[#allocation8 + $0x3d8] sm:$0xff] %v116_v28 }
  0x63   :  { %288 = vst [vmem:[#allocation8 + $0x498] sm:$0xff] %v116_v28  ;;  %296 = vst [vmem:[#allocation8 + $0x558] sm:$0xff] %v116_v28 }
  0x64   :  { %241 = vst [vmem:[#allocation8 + $0x30] sm:$0xff] %v120_v29  ;;  %249 = vst [vmem:[#allocation8 + $0xf0] sm:$0xff] %v120_v29 }
  0x65   :  { %257 = vst [vmem:[#allocation8 + $0x1b0] sm:$0xff] %v120_v29  ;;  %265 = vst [vmem:[#allocation8 + $0x270] sm:$0xff] %v120_v29 }
  0x66   :  { %273 = vst [vmem:[#allocation8 + $0x330] sm:$0xff] %v120_v29  ;;  %281 = vst [vmem:[#allocation8 + $0x3f0] sm:$0xff] %v120_v29 }
  0x67   :  { %289 = vst [vmem:[#allocation8 + $0x4b0] sm:$0xff] %v120_v29  ;;  %297 = vst [vmem:[#allocation8 + $0x570] sm:$0xff] %v120_v29 }
  0x68   :  { %243 = vst [vmem:[#allocation8 + $0x60] sm:$0xff] %v128_v31  ;;  %251 = vst [vmem:[#allocation8 + $0x120] sm:$0xff] %v128_v31 }
  0x69   :  { %259 = vst [vmem:[#allocation8 + $0x1e0] sm:$0xff] %v128_v31  ;;  %267 = vst [vmem:[#allocation8 + $0x2a0] sm:$0xff] %v128_v31 }
  0x6a   :  { %275 = vst [vmem:[#allocation8 + $0x360] sm:$0xff] %v128_v31  ;;  %283 = vst [vmem:[#allocation8 + $0x420] sm:$0xff] %v128_v31 }
  0x6b   :  { %291 = vst [vmem:[#allocation8 + $0x4e0] sm:$0xff] %v128_v31  ;;  %299 = vst [vmem:[#allocation8 + $0x5a0] sm:$0xff] %v128_v31 }
  0x6c   :  { %311 = vst [vmem:[#allocation8 + $0xc8] sm:$0xff] %v206_v34  ;;  %312 = vst [vmem:[#allocation8 + $0xe0] sm:$0xff] %v206_v34 }
  0x6d   :  { %313 = vst [vmem:[#allocation8 + $0xf8] sm:$0xff] %v206_v34  ;;  %314 = vst [vmem:[#allocation8 + $0x110] sm:$0xff] %v206_v34 }
  0x6e   :  { %315 = vst [vmem:[#allocation8 + $0x128] sm:$0xff] %v206_v34  ;;  %316 = vst [vmem:[#allocation8 + $0x140] sm:$0xff] %v206_v34 }
  0x6f   :  { %317 = vst [vmem:[#allocation8 + $0x158] sm:$0xff] %v206_v34  ;;  %318 = vst [vmem:[#allocation8 + $0x170] sm:$0xff] %v206_v34 }
  0x70   :  { %319 = vst [vmem:[#allocation8 + $0x188] sm:$0xff] %v210_v35  ;;  %320 = vst [vmem:[#allocation8 + $0x1a0] sm:$0xff] %v210_v35 }
  0x71   :  { %321 = vst [vmem:[#allocation8 + $0x1b8] sm:$0xff] %v210_v35  ;;  %322 = vst [vmem:[#allocation8 + $0x1d0] sm:$0xff] %v210_v35 }
  0x72   :  { %323 = vst [vmem:[#allocation8 + $0x1e8] sm:$0xff] %v210_v35  ;;  %324 = vst [vmem:[#allocation8 + $0x200] sm:$0xff] %v210_v35 }
  0x73   :  { %325 = vst [vmem:[#allocation8 + $0x218] sm:$0xff] %v210_v35  ;;  %326 = vst [vmem:[#allocation8 + $0x230] sm:$0xff] %v210_v35 }
  0x74   :  { %242 = vst [vmem:[#allocation8 + $0x48] sm:$0xff] %v124_v36  ;;  %250 = vst [vmem:[#allocation8 + $0x108] sm:$0xff] %v124_v36 }
  0x75   :  { %258 = vst [vmem:[#allocation8 + $0x1c8] sm:$0xff] %v124_v36  ;;  %266 = vst [vmem:[#allocation8 + $0x288] sm:$0xff] %v124_v36 }
  0x76   :  { %274 = vst [vmem:[#allocation8 + $0x348] sm:$0xff] %v124_v36  ;;  %282 = vst [vmem:[#allocation8 + $0x408] sm:$0xff] %v124_v36 }
  0x77   :  { %290 = vst [vmem:[#allocation8 + $0x4c8] sm:$0xff] %v124_v36  ;;  %298 = vst [vmem:[#allocation8 + $0x588] sm:$0xff] %v124_v36 }
  0x78   :  { %244 = vst [vmem:[#allocation8 + $0x78] sm:$0xff] %v132_v40  ;;  %252 = vst [vmem:[#allocation8 + $0x138] sm:$0xff] %v132_v40 }
  0x79   :  { %260 = vst [vmem:[#allocation8 + $0x1f8] sm:$0xff] %v132_v40  ;;  %268 = vst [vmem:[#allocation8 + $0x2b8] sm:$0xff] %v132_v40 }
  0x7a   :  { %276 = vst [vmem:[#allocation8 + $0x378] sm:$0xff] %v132_v40  ;;  %284 = vst [vmem:[#allocation8 + $0x438] sm:$0xff] %v132_v40 }
  0x7b   :  { %292 = vst [vmem:[#allocation8 + $0x4f8] sm:$0xff] %v132_v40  ;;  %300 = vst [vmem:[#allocation8 + $0x5b8] sm:$0xff] %v132_v40 }
  0x7c   :  { %245 = vst [vmem:[#allocation8 + $0x90] sm:$0xff] %v136_v41  ;;  %253 = vst [vmem:[#allocation8 + $0x150] sm:$0xff] %v136_v41 }
  0x7d   :  { %261 = vst [vmem:[#allocation8 + $0x210] sm:$0xff] %v136_v41  ;;  %269 = vst [vmem:[#allocation8 + $0x2d0] sm:$0xff] %v136_v41 }
  0x7e   :  { %277 = vst [vmem:[#allocation8 + $0x390] sm:$0xff] %v136_v41  ;;  %285 = vst [vmem:[#allocation8 + $0x450] sm:$0xff] %v136_v41 }
  0x7f   :  { %293 = vst [vmem:[#allocation8 + $0x510] sm:$0xff] %v136_v41  ;;  %301 = vst [vmem:[#allocation8 + $0x5d0] sm:$0xff] %v136_v41 }
  0x80   :  { %327 = vst [vmem:[#allocation8 + $0x248] sm:$0xff] %v214_v43  ;;  %328 = vst [vmem:[#allocation8 + $0x260] sm:$0xff] %v214_v43 }
  0x81   :  { %329 = vst [vmem:[#allocation8 + $0x278] sm:$0xff] %v214_v43  ;;  %330 = vst [vmem:[#allocation8 + $0x290] sm:$0xff] %v214_v43 }
  0x82   :  { %331 = vst [vmem:[#allocation8 + $0x2a8] sm:$0xff] %v214_v43  ;;  %332 = vst [vmem:[#allocation8 + $0x2c0] sm:$0xff] %v214_v43 }
  0x83   :  { %333 = vst [vmem:[#allocation8 + $0x2d8] sm:$0xff] %v214_v43  ;;  %334 = vst [vmem:[#allocation8 + $0x2f0] sm:$0xff] %v214_v43 }
  0x84   :  { %335 = vst [vmem:[#allocation8 + $0x308] sm:$0xff] %v218_v44  ;;  %336 = vst [vmem:[#allocation8 + $0x320] sm:$0xff] %v218_v44 }
  0x85   :  { %337 = vst [vmem:[#allocation8 + $0x338] sm:$0xff] %v218_v44  ;;  %338 = vst [vmem:[#allocation8 + $0x350] sm:$0xff] %v218_v44 }
  0x86   :  { %339 = vst [vmem:[#allocation8 + $0x368] sm:$0xff] %v218_v44  ;;  %340 = vst [vmem:[#allocation8 + $0x380] sm:$0xff] %v218_v44 }
  0x87   :  { %341 = vst [vmem:[#allocation8 + $0x398] sm:$0xff] %v218_v44  ;;  %342 = vst [vmem:[#allocation8 + $0x3b0] sm:$0xff] %v218_v44 }
  0x88   :  { %246 = vst [vmem:[#allocation8 + $0xa8] sm:$0xff] %v140_v47  ;;  %254 = vst [vmem:[#allocation8 + $0x168] sm:$0xff] %v140_v47 }
  0x89   :  { %262 = vst [vmem:[#allocation8 + $0x228] sm:$0xff] %v140_v47  ;;  %270 = vst [vmem:[#allocation8 + $0x2e8] sm:$0xff] %v140_v47 }
  0x8a   :  { %278 = vst [vmem:[#allocation8 + $0x3a8] sm:$0xff] %v140_v47  ;;  %286 = vst [vmem:[#allocation8 + $0x468] sm:$0xff] %v140_v47 }
  0x8b   :  { %294 = vst [vmem:[#allocation8 + $0x528] sm:$0xff] %v140_v47  ;;  %302 = vst [vmem:[#allocation8 + $0x5e8] sm:$0xff] %v140_v47 }
  0x8c   :  { %343 = vst [vmem:[#allocation8 + $0x3c8] sm:$0xff] %v222_v48  ;;  %344 = vst [vmem:[#allocation8 + $0x3e0] sm:$0xff] %v222_v48 }
  0x8d   :  { %345 = vst [vmem:[#allocation8 + $0x3f8] sm:$0xff] %v222_v48  ;;  %346 = vst [vmem:[#allocation8 + $0x410] sm:$0xff] %v222_v48 }
  0x8e   :  { %347 = vst [vmem:[#allocation8 + $0x428] sm:$0xff] %v222_v48  ;;  %348 = vst [vmem:[#allocation8 + $0x440] sm:$0xff] %v222_v48 }
  0x8f   :  { %349 = vst [vmem:[#allocation8 + $0x458] sm:$0xff] %v222_v48  ;;  %350 = vst [vmem:[#allocation8 + $0x470] sm:$0xff] %v222_v48 }
  0x90   :  { %351 = vst [vmem:[#allocation8 + $0x488] sm:$0xff] %v226_v49  ;;  %352 = vst [vmem:[#allocation8 + $0x4a0] sm:$0xff] %v226_v49 }
  0x91   :  { %353 = vst [vmem:[#allocation8 + $0x4b8] sm:$0xff] %v226_v49  ;;  %354 = vst [vmem:[#allocation8 + $0x4d0] sm:$0xff] %v226_v49 }
  0x92   :  { %355 = vst [vmem:[#allocation8 + $0x4e8] sm:$0xff] %v226_v49  ;;  %356 = vst [vmem:[#allocation8 + $0x500] sm:$0xff] %v226_v49 }
  0x93   :  { %357 = vst [vmem:[#allocation8 + $0x518] sm:$0xff] %v226_v49  ;;  %358 = vst [vmem:[#allocation8 + $0x530] sm:$0xff] %v226_v49 }
  0x94   :  { %359 = vst [vmem:[#allocation8 + $0x548] sm:$0xff] %v230_v51  ;;  %360 = vst [vmem:[#allocation8 + $0x560] sm:$0xff] %v230_v51 }
  0x95   :  { %361 = vst [vmem:[#allocation8 + $0x578] sm:$0xff] %v230_v51  ;;  %362 = vst [vmem:[#allocation8 + $0x590] sm:$0xff] %v230_v51 }
  0x96   :  { %363 = vst [vmem:[#allocation8 + $0x5a8] sm:$0xff] %v230_v51  ;;  %364 = vst [vmem:[#allocation8 + $0x5c0] sm:$0xff] %v230_v51 }
  0x97   :  { %365 = vst [vmem:[#allocation8 + $0x5d8] sm:$0xff] %v230_v51  ;;  %366 = vst [vmem:[#allocation8 + $0x5f0] sm:$0xff] %v230_v51 }
  0x98   :  { %537 = shalt.err (!%p534_p0)
}
  0x99   :  { %s538_s25 = scalar_lea.hbm %s802_s3, 24576 }
  0x9a   :  { %p539_p1 = scmp.ne.s32.totalorder %s802_s3, %s538_s25  ;;  %p542_p2 = scmp.lt.u32.totalorder %s538_s25, %s802_s3 }
  0x9c   :  { %p544_p3 = pnand %p542_p2, %p539_p1 }
  0x9e   :  { %547 = shalt.err (!%p544_p3)
}
  0x9f   :  { %s561_s30 = smov 384   ;;  %s562_s4 = smov 24  }
  0xa0   :  { %442 = dma.vmem_to_hbm [thread:$0]  %s437_s21, 24576, %s802_s3, [#allocation4], %s561_s30, %s561_s30, %s562_s4  }
  0xa1   :  { %552 = dma.done.wait [#allocation4], 24576  }
  0xa2   :  { %553 = vsyncadd [#allocation4], 4294942720 }
  0xa3   :  { %446 = vsyncpa [#allocation3], 1 }
  0xa4   :  { %447 = vsyncpa [#allocation6], 1 }
  0xa5   :  { %448 = vsyncpa [#allocation4], 1 }

</bundles_post_ra>
